<compile_context>
chip_gen: v6e
topology: v6e:2x2x1
jax: 0.10.0
libtpu: 0.0.40
codegen_flags: <defaults>
</compile_context>

<pallas_src>
import jax
import jax.numpy as jnp
import numpy as np
from jax.experimental import pallas as pl
from jax.experimental.pallas import tpu as pltpu


def _dimreduce_kernel(w_ref, shift_ref, x_ref, o_ref):
    # w_ref:     (C_out, C_in)  BN-scale-folded conv weight (whole array)
    # shift_ref: (C_out, 1)     folded BN shift = beta - mean * scale  (f32)
    # x_ref:     (C_in, thw)    one spatial tile of x[n] (NCHW, HW flattened)
    # o_ref:     (C_out, thw)   lane-dense output tile
    acc = jnp.dot(w_ref[...], x_ref[...], preferred_element_type=jnp.float32)
    y = acc + shift_ref[...]                      # f32 epilogue
    o_ref[...] = jnp.maximum(y, 0.0).astype(o_ref.dtype)


def _round_up(a, b):
    return (a + b - 1) // b * b


def dim_reduce_layer(x_nchw, conv_w, gamma, beta, running_mean, running_var,
                     eps=1e-5, compute_dtype=None):
    """Forward of DimReduceLayer (BatchNorm in eval mode).

    x_nchw : [N, C_in, H, W]
    conv_w : [C_out, C_in]   (PyTorch 1x1 conv weight squeezed of its 1x1 dims)
    compute_dtype : dtype used to stream x / W through the MXU (default: x's
                    dtype). Use jnp.bfloat16 to halve input HBM traffic; the
                    accumulation and epilogue stay in f32.
    """
    N, C_in, H, W = x_nchw.shape
    C_out = conv_w.shape[0]
    HW = H * W
    out_dtype = x_nchw.dtype
    if compute_dtype is None:
        compute_dtype = x_nchw.dtype

    # --- fold BatchNorm into the conv weights (exact linear fold, f32 math) ---
    scale = gamma.astype(jnp.float32) / jnp.sqrt(running_var.astype(jnp.float32) + eps)
    shift = beta.astype(jnp.float32) - running_mean.astype(jnp.float32) * scale
    w_bn = (conv_w.astype(jnp.float32) * scale[:, None]).astype(compute_dtype)  # [C_out, C_in]
    shift2d = shift.reshape(C_out, 1).astype(jnp.float32)

    # --- choose the HW (lane) tile ---------------------------------------
    in_bytes = jnp.dtype(compute_dtype).itemsize
    out_bytes = jnp.dtype(out_dtype).itemsize
    bytes_per_col = C_in * in_bytes + C_out * out_bytes
    # Keep double-buffered (input tile + output tile) under ~8 MiB so we fit
    # the smallest default scoped-VMEM limit (16 MiB on v5e) with headroom.
    budget = 8 * 1024 * 1024
    cols_fit = max(128, (budget // (2 * bytes_per_col)) // 128 * 128)
    thw = max(128, min(_round_up(HW, 128), 2048, cols_fit))
    HW_pad = _round_up(HW, thw)

    # --- flatten spatial dims, pad the ragged tail (sliced off afterwards) ---
    x3d = x_nchw.reshape(N, C_in, HW)
    if HW_pad != HW:
        x3d = jnp.pad(x3d, ((0, 0), (0, 0), (0, HW_pad - HW)))
    x3d = x3d.astype(compute_dtype)

    cost = pl.CostEstimate(
        flops=2 * N * HW * C_in * C_out,
        transcendentals=0,
        bytes_accessed=(N * C_in * HW_pad * in_bytes
                        + C_out * C_in * in_bytes
                        + N * C_out * HW_pad * out_bytes),
    )

    out3d = pl.pallas_call(
        _dimreduce_kernel,
        out_shape=jax.ShapeDtypeStruct((N, C_out, HW_pad), out_dtype),
        grid_spec=pltpu.PrefetchScalarGridSpec(
            num_scalar_prefetch=0,
            grid=(N, HW_pad // thw),
            in_specs=[
                pl.BlockSpec((C_out, C_in), lambda n, t: (0, 0)),       # folded weights
                pl.BlockSpec((C_out, 1), lambda n, t: (0, 0)),          # BN shift
                pl.BlockSpec((None, C_in, thw), lambda n, t: (n, 0, t)),  # x tile
            ],
            out_specs=pl.BlockSpec((None, C_out, thw), lambda n, t: (n, 0, t)),
        ),
        compiler_params=pltpu.CompilerParams(
            dimension_semantics=("parallel", "parallel")),  # v7x: shard 2 TCs
        cost_estimate=cost,
    )(w_bn, shift2d, x3d)

    return out3d[:, :, :HW].reshape(N, C_out, H, W)


def _reference(x_nchw, conv_w, gamma, beta, mean, var, eps=1e-5):
    # pure-JAX reference of conv1x1 (no bias) + eval-mode BN + ReLU
    y = jnp.einsum('nchw,oc->nohw', x_nchw, conv_w)
    s = gamma / jnp.sqrt(var + eps)
    y = y * s[None, :, None, None] + (beta - mean * s)[None, :, None, None]
    return jnp.maximum(y, 0.0)


if __name__ == "__main__":
    key = jax.random.PRNGKey(0)
    k_x, k_w, k_g, k_b, k_m, k_v = jax.random.split(key, 6)

    N, C_in, H, W = 2, 16, 16, 16
    C_out = 8

    x = jax.random.normal(k_x, (N, C_in, H, W), dtype=jnp.float32)
    # conv weight shape in torch: (C_out, C_in, 1, 1); squeeze the 1x1 dims.
    conv_w = jax.random.normal(k_w, (C_out, C_in), dtype=jnp.float32) * 0.1
    # Deterministic BatchNorm parameters / running stats (eval-mode BN).
    gamma = 1.0 + 0.1 * jax.random.normal(k_g, (C_out,), dtype=jnp.float32)
    beta = 0.1 * jax.random.normal(k_b, (C_out,), dtype=jnp.float32)
    running_mean = 0.1 * jax.random.normal(k_m, (C_out,), dtype=jnp.float32)
    running_var = 1.0 + 0.1 * jax.random.uniform(k_v, (C_out,), dtype=jnp.float32)

    ref = _reference(x, conv_w, gamma, beta, running_mean, running_var)

    # 1) f32 path (exact semantics of the PyTorch module)
    out = dim_reduce_layer(x, conv_w, gamma, beta, running_mean, running_var)
    out = jax.block_until_ready(out)
    np.testing.assert_allclose(np.asarray(out), np.asarray(ref),
                               rtol=1e-5, atol=1e-5)

    # 2) bf16-streaming path (bandwidth optimization; f32 accumulation/epilogue)
    out_bf16 = dim_reduce_layer(x, conv_w, gamma, beta, running_mean,
                                running_var, compute_dtype=jnp.bfloat16)
    out_bf16 = jax.block_until_ready(out_bf16)
    np.testing.assert_allclose(np.asarray(out_bf16), np.asarray(ref),
                               rtol=5e-2, atol=5e-2)

    # 3) ragged spatial size (H*W not a multiple of 128) exercises the padded tail
    x_odd = x[:, :, :, :13]                       # HW = 16*13 = 208
    out_odd = dim_reduce_layer(x_odd, conv_w, gamma, beta,
                               running_mean, running_var)
    out_odd = jax.block_until_ready(out_odd)
    ref_odd = _reference(x_odd, conv_w, gamma, beta, running_mean, running_var)
    np.testing.assert_allclose(np.asarray(out_odd), np.asarray(ref_odd),
                               rtol=1e-5, atol=1e-5)

    print("KERNEL_OK")
</pallas_src>

<mosaic_0001>
module attributes {stable_mosaic.version = 11 : i64} {
  func.func @_dimreduce_kernel(%arg0: i32, %arg1: i32, %arg2: memref<8x16xf32, #tpu.memory_space<vmem>>, %arg3: memref<8x1xf32, #tpu.memory_space<vmem>>, %arg4: memref<1x16x256xf32, #tpu.memory_space<vmem>>, %arg5: memref<1x8x256xf32, #tpu.memory_space<vmem>>) attributes {dimension_semantics = [#tpu.dimension_semantics<parallel>, #tpu.dimension_semantics<parallel>], iteration_bounds = array<i64: 2, 1>, scalar_prefetch = 0 : i64, scratch_operands = 0 : i64, tpu.core_type = #tpu.core_type<tc>, window_params = [{pipeline_mode = #tpu.pipeline_mode<synchronous>, transform_indices = @transform_0, window_bounds = array<i64: 8, 16>}, {pipeline_mode = #tpu.pipeline_mode<synchronous>, transform_indices = @transform_1, window_bounds = array<i64: 8, 1>}, {transform_indices = @transform_2, window_bounds = array<i64: 1, 16, 256>}, {transform_indices = @transform_3, window_bounds = array<i64: 1, 8, 256>}]} {
    %c0 = arith.constant 0 : index
    %c0_0 = arith.constant 0 : index
    %0 = vector.load %arg2[%c0, %c0_0] : memref<8x16xf32, #tpu.memory_space<vmem>>, vector<8x16xf32>
    %c0_1 = arith.constant 0 : index
    %c0_2 = arith.constant 0 : index
    %c0_3 = arith.constant 0 : index
    %1 = vector.load %arg4[%c0_1, %c0_2, %c0_3] : memref<1x16x256xf32, #tpu.memory_space<vmem>>, vector<1x16x256xf32>
    %2 = vector.shape_cast %1 : vector<1x16x256xf32> to vector<16x256xf32>
    %cst = arith.constant dense<0.000000e+00> : vector<8x256xf32>
    %3 = tpu.matmul %0, %2, %cst {dimension_numbers = #tpu.dot_dimension_numbers<[1], [0], [0], [1], [0, 0, 1, 1], [], []>} : vector<8x16xf32>, vector<16x256xf32>, vector<8x256xf32> -> vector<8x256xf32>
    %c0_4 = arith.constant 0 : index
    %c0_5 = arith.constant 0 : index
    %4 = vector.load %arg3[%c0_4, %c0_5] : memref<8x1xf32, #tpu.memory_space<vmem>>, vector<8x1xf32>
    %5 = vector.broadcast %4 : vector<8x1xf32> to vector<8x256xf32>
    %6 = arith.addf %3, %5 : vector<8x256xf32>
    %cst_6 = arith.constant 0.000000e+00 : f32
    %7 = vector.broadcast %cst_6 : f32 to vector<8x256xf32>
    %8 = arith.maximumf %6, %7 : vector<8x256xf32>
    %c0_7 = arith.constant 0 : index
    %c0_8 = arith.constant 0 : index
    %c0_9 = arith.constant 0 : index
    %9 = vector.load %arg5[%c0_7, %c0_8, %c0_9] : memref<1x8x256xf32, #tpu.memory_space<vmem>>, vector<1x8x256xf32>
    %10 = vector.shape_cast %9 : vector<1x8x256xf32> to vector<8x256xf32>
    %11 = vector.shape_cast %8 : vector<8x256xf32> to vector<1x8x256xf32>
    tpu.vector_store %arg5[%c0_7, %c0_8, %c0_9], %11 {strides = array<i32>} : memref<1x8x256xf32, #tpu.memory_space<vmem>>, vector<1x8x256xf32>,
    return
  }
  func.func @transform_0(%arg0: i32, %arg1: i32) -> (i32, i32) {
    %c0_i32 = arith.constant 0 : i32
    %c0_i32_0 = arith.constant 0 : i32
    %c0_i32_1 = arith.constant 0 : i32
    return %c0_i32, %c0_i32_0 : i32, i32
  }
  func.func @transform_1(%arg0: i32, %arg1: i32) -> (i32, i32) {
    %c0_i32 = arith.constant 0 : i32
    %c0_i32_0 = arith.constant 0 : i32
    %c0_i32_1 = arith.constant 0 : i32
    return %c0_i32, %c0_i32_0 : i32, i32
  }
  func.func @transform_2(%arg0: i32, %arg1: i32) -> (i32, i32, i32) {
    %c0_i32 = arith.constant 0 : i32
    %c0_i32_0 = arith.constant 0 : i32
    return %arg0, %c0_i32, %arg1 : i32, i32, i32
  }
  func.func @transform_3(%arg0: i32, %arg1: i32) -> (i32, i32, i32) {
    %c0_i32 = arith.constant 0 : i32
    %c0_i32_0 = arith.constant 0 : i32
    return %arg0, %c0_i32, %arg1 : i32, i32, i32
  }
}

</mosaic_0001>

<bundles_post_ra>
// kernel: tpu_custom_call.1
= control target key start
LH: loop header
LB: loop body
LE: loop exit
PB: predicated region body
PF: predicated region fallthrough
CT: control target
= control target key end

     0   :  { %8 = vsyncpa [#allocation3], 0  ;;  %s760_s0 = inlined_call_operand.vmem [shape: f32[8,16], index: 0, kind: input, shape index: {}]   ;;  %s761_s1 = inlined_call_operand.vmem [shape: f32[8,1], index: 1, kind: input, shape index: {}]   ;;  %s762_s2 = inlined_call_operand.hbm [shape: f32[2,16,256], index: 2, kind: input, shape index: {}]   ;;  %s763_s3 = inlined_call_operand.hbm [shape: f32[2,8,256], index: 3, kind: output, shape index: {}]  }
   0x1   :  { %10 = vsyncpa [#allocation3 + $0x1], 0 }
   0x2   :  { %11 = vsyncpa [#allocation4], 0 }
   0x3   :  { %13 = vsyncpa [#allocation4 + $0x1], 0  ;;  %s621_s12 = smov 0   ;;  %s623_s13 = smov 0  }
   0x4   :  { %s625_s14 = smov 0   ;;  %s627_s15 = smov 0  }
   0x5   :  { %s629_s16 = smov 0   ;;  %s631_s17 = smov 0  }
   0x6 LB: > { %s400_s18 = sadd.s32 4294967295, %s593_s17   ;;  %s401_s19 = sadd.s32 4294967294, %s593_s17   ;;  %s593_s17 = sphi %s631_s17, %s19_s17   ;;  %s589_s16 = sphi %s629_s16, %s774_s16   ;;  %s585_s15 = sphi %s627_s15, %s773_s15   ;;  %s581_s14 = sphi %s625_s14, %s772_s14   ;;  %s577_s13 = sphi %s623_s13, %s771_s13   ;;  %s573_s12 = sphi %s621_s12, %s770_s12  }
   0x7   : > { %s31_s20 = sadd.s32 1, %s589_s16  ;;  %s82_s21 = sadd.s32 1, %s581_s14 }
   0x8   : > { %p33_p0 = scmp.ge.s32.totalorder %s31_s20, 2  ;;  %p89_p1 = scmp.ne.s32.totalorder %s581_s14, %s577_s13 }
   0x9   : > { %p90_p2 = scmp.eq.s32.totalorder %s593_s17, 0  ;;  %p95_p3 = scmp.ne.s32.totalorder %s577_s13, %s573_s12 }
   0xa   : > { %s776_s20 = smov (%p33_p0, %s31_s20), 0  ;;  %p96_p5 = scmp.eq.s32.totalorder %s400_s18, 0 }
   0xb   : > { %p662_p4 = por %p90_p2, %p89_p1  ;;  %s77_s23 = ssub.s32 %s589_s16, %s776_s20 }
   0xc   : > { %p121_p6 = scmp.eq.s32.totalorder %s400_s18, 1  ;;  %p80_p7 = scmp.eq.s32.totalorder %s77_s23, 0 }
   0xd   : > { %p668_p8 = por %p96_p5, %p95_p3  ;;  %p127_p10 = scmp.eq.s32.totalorder %s401_s19, 1 }
   0xe   : > { %p672_p9 = por %p121_p6, %p89_p1  ;;  %p430_p13 = scmp.lt.s32.totalorder %s593_s17, 2 }
   0xf   : > { %s677_s26 = scalar_select %p80_p7, %s581_s14, %s82_s21  }
  0x10   : > { %p679_p11 = por %p127_p10, %p95_p3  ;;  %s153_s28 = sand.u32 1, %s581_s14  }
  0x11   : > { %s404_s29 = sshll.u32 %s153_s28, 5  ;;  %s416_s30 = sshll.u32 %s589_s16, 9 }
  0x12   : > { %s165_s6 = scalar_lea.hbm %s762_s2, %s416_s30  ;;  %s157_s7 = scalar_lea.vmem [#allocation2], %s404_s29 }
  0x13   : > { %s166_s8 = sshll.u32 %s157_s7, 4  ;;  %p692_p0 = pnand %p430_p13, %p662_p4  ;;  %s167_s8 = int_to_ptr.vmem [resolvable:$true] %s166_s8 }
  0x14   : > { %p407_p1 = scmp.ge.s32.totalorder %s593_s17, 1  ;;  %s154_s10 = scalar_lea.sflag [#allocation3], %s153_s28 }
  0x15   : > { %p487_p2 = pneg %p692_p0  ;;  %s498_s11 = scalar_lea.vmem %s167_s8, 512 }
  0x16   : > { %p499_p3 = scmp.ne.s32.totalorder %s167_s8, %s498_s11  ;;  %s595_s18 = smov [#allocation2]  }
  0x17   : > { %s503_s19 = sshll.u32 %s595_s18, 4  ;;  %s504_s19 = int_to_ptr.vmem [resolvable:$false] %s503_s19 }
  0x18   : > { %p501_p5 = pnand %p499_p3, %p487_p2  ;;  %s505_s21 = scalar_lea.vmem %s504_s19, 1024 }
  0x19   : > { %p506_p7 = scmp.lt.s32.totalorder %s167_s8, %s504_s19  ;;  %p507_p10 = scmp.lt.s32.totalorder %s505_s21, %s498_s11 }
  0x1a   : > { %p502_p6 = pneg %p501_p5 }
  0x1b   : > { %p508_p12 = por %p507_p10, %p506_p7 }
  0x1d   : > { %p509_p4 = pnand %p508_p12, %p502_p6 }
  0x1f   : > { %512 = shalt.err (!%p509_p4)
}
  0x20   : > { %s596_s22 = smov 256   ;;  %s597_s23 = smov 16  }
  0x21   : > { %425 = dma.hbm_to_vmem [thread:$0]  (!%p692_p0), %s165_s6, 512, %s167_s8, %s154_s10, %s596_s22, %s596_s22, %s597_s23  }
  0x22   : > { %p174_p13 = scmp.lt.s32.totalorder %s593_s17, 3 }
  0x24   : > { %p175_p2 = pnand %p407_p1, %p174_p13 }
  0x25   : > { %s705_s28 = sand.u32 (!%p175_p2), 1, %s577_s13  }
  0x26   : > { %178 = sbr.rel (%p175_p2) target bundleno = 262 (0x106), region = 32  ;;  %s408_s29 = sshll.u32 (!%p175_p2), %s705_s28, 5 }
  0x27   : > { %s181_s30 = scalar_lea.sflag (!%p175_p2), [#allocation3], %s705_s28  ;;  %s184_s4 = scalar_lea.vmem (!%p175_p2), [#allocation2], %s408_s29 }
  0x2b   : > { %564 = dma.done.wait (%p668_p8), %s181_s30, 512  }
  0x2c   : > { %566 = vsyncadd (%p668_p8), %s181_s30, 4294966784  ;;  %v598_v0 = vmov 0.0   ;;  %v599_v1 = vmov 0   ;;  %v213_v2 = vld [vmem:[%s184_s4 + $0x18] sm:$0xff]  ;;  %v212_v3 = vld [vmem:[%s184_s4 + $0x10] sm:$0xff]  ;;  %vm220_vm0 = vcmask 130048  }
  0x2d   : > { %288 = vmatprep.mubr.f32.mxu0 %v598_v0  ;;  %484 = vset.pattern.permute.xlu0 %v599_v1  ;;  %v211_v4 = vld [vmem:[%s184_s4 + $0x8] sm:$0xff]  ;;  %v210_v5 = vld [vmem:[%s184_s4] sm:$0xff]  ;;  %s409_s24 = sshll.u32 %s705_s28, 4  ;;  %s417_s9 = sshll.u32 %s585_s15, 8 }
  0x2e   : > { %252 = vmatprep.subr.mxu0 %v213_v2  ;;  %v214_v6 = vld [vmem:[%s761_s1] sm:$0xff]  ;;  %s206_s10 = scalar_lea.vmem [#allocation5], %s409_s24  ;;  %s314_s21 = scalar_lea.hbm %s763_s3, %s417_s9 }
  0x2f   : > { %253 = vmatpush1.msra.mxu0 %v212_v3  ;;  %v209_v7 = vld [vmem:[%s760_s0] sm:$0xff]  ;;  %217 = vperm.xlu0 %484, %v214_v6   ;;  %s316_s11 = sshll.u32 %s206_s10, 4  ;;  %s300_s22 = scalar_lea.sflag [#allocation4], %s705_s28  ;;  %s317_s11 = int_to_ptr.vmem [resolvable:$true] %s316_s11 }
  0x30   : > { %254 = vmatprep.subr.mxu0 %v211_v4  ;;  %s513_s23 = scalar_lea.vmem %s317_s11, 256  ;;  %s600_s29 = smov [#allocation5]  }
  0x31   : > { %255 = vmatpush1.msra.mxu0 %v210_v5  ;;  %p514_p8 = scmp.ne.s32.totalorder %s317_s11, %s513_s23  ;;  %s517_s15 = sshll.u32 %s600_s29, 4  ;;  %s518_s15 = int_to_ptr.vmem [resolvable:$false] %s517_s15 }
  0x32   : > { %410 = vmatmul.mubr.msk.f32.vlgmr.msra.gmra.mxu0 %vm220_vm0, %v209_v7  ;;  %s519_s30 = scalar_lea.vmem %s518_s15, 512  ;;  %p520_p1 = scmp.lt.s32.totalorder %s317_s11, %s518_s15 }
  0x33   : > { %p515_p12 = pnand %p514_p8, %p672_p9  ;;  %p521_p3 = scmp.lt.s32.totalorder %s519_s30, %s513_s23 }
  0x35   : > { %p516_p0 = pneg %p515_p12  ;;  %p522_p5 = por %p521_p3, %p520_p1 }
  0x37   : > { %p523_p6 = pnand %p522_p5, %p516_p0 }
  0xaa   : > { %v218_v8 = vpop.permute.xlu0 %217 }
  0xf2   : > { %v290_v9 = vpop.f32.mrf.mxu0 }
  0xf3   : > { %v291_v10 = vadd.f32 %v290_v9, %v218_v8 }
  0xf4   : > { %v292_v11 = vpop.f32.mrf.mxu0 }
  0xf5   : > { %v295_v12 = vmax.f32 %v291_v10, 0.0  ;;  %v293_v13 = vadd.f32 %v292_v11, %v218_v8 }
  0xf7   : > { %297 = vst [vmem:[%s206_s10] sm:$0xff] %v295_v12  ;;  %v296_v14 = vmax.f32 %v293_v13, 0.0 }
  0xf9   : > { %298 = vst [vmem:[%s206_s10 + $0x8] sm:$0xff] %v296_v14 }
  0xfa   : > { %526 = shalt.err (!%p523_p6)
}
  0xfb   : > { %s527_s4 = scalar_lea.hbm %s314_s21, 256  ;;  %s531_s6 = scalar_lea.hbm %s763_s3, 512 }
  0xfc   : > { %p528_p7 = scmp.ne.s32.totalorder %s314_s21, %s527_s4  ;;  %p532_p13 = scmp.lt.s32.totalorder %s314_s21, %s763_s3 }
  0xfd   : > { %p533_p2 = scmp.lt.s32.totalorder %s531_s6, %s527_s4 }
  0xfe   : > { %p529_p10 = pnand %p528_p7, %p672_p9 }
  0xff   : > { %p534_p8 = por %p533_p2, %p532_p13 }
 0x100   : > { %p530_p4 = pneg %p529_p10 }
 0x102   : > { %p535_p12 = pnand %p534_p8, %p530_p4 }
 0x104   : > { %538 = shalt.err (!%p535_p12)
}
 0x105   : > { %420 = dma.vmem_to_hbm [thread:$0]  (%p672_p9), %s317_s11, 256, %s314_s21, %s300_s22  }
 0x106 PF: > { %s328_s24 = sand.u32 1, %s573_s12   ;;  %p769_p0 = scmp.ge.s32.totalorder %s593_s17, 2 }
 0x107   : > { %s329_s9 = scalar_lea.sflag [#allocation4], %s328_s24 }
 0x108   : > { %p427_p1 = pnand %p769_p0, %p679_p11 }
 0x10a   : > { %p428_p3 = pneg %p427_p1 }
 0x10c   : > { %568 = dma.done.wait (%p428_p3), %s329_s9, 256  }
 0x10d   : > { %570 = vsyncadd (%p428_p3), %s329_s9, 4294967040  ;;  %s19_s17 = sadd.s32 1, %s593_s17   ;;  %s770_s12 = smov %s577_s13 }
 0x10e   : > { %p16_p5 = scmp.ge.s32.totalorder %s19_s17, 4   ;;  %s771_s13 = smov %s581_s14 }
 0x10f   : > { %s772_s14 = smov %s677_s26  ;;  %s773_s15 = smov %s589_s16 }
 0x110   : > { %s774_s16 = smov %s776_s20  ;;  %18 = sbr.rel (!%p16_p5) target bundleno = 6 (0x6), region = 77 }
 0x115   :  { %334 = vsyncpa [#allocation3], 1 }
 0x116   :  { %336 = vsyncpa [#allocation3 + $0x1], 1 }
 0x117   :  { %337 = vsyncpa [#allocation4], 1 }
 0x118   :  { %339 = vsyncpa [#allocation4 + $0x1], 1 }

</bundles_post_ra>
